<compile_context>
chip_gen: v7x
topology: tpu7x:2x2x1
jax: 0.10.0
libtpu: 0.0.40
codegen_flags: <defaults>
</compile_context>

<pallas_src>
import math
import functools

import jax
import jax.numpy as jnp
from jax import lax
from jax.experimental import pallas as pl
from jax.experimental.pallas import tpu as pltpu


def _attend(xq, k, wqT, bq, att, start, tq, seq_len, out_ref):
    """Q projection + masked softmax for one (TQ, L) score tile.

    xq:  (TQ, H) bf16 query rows      k:   (L, H) bf16 projected keys
    wqT: (H, H)  bf16 pre-scaled Wq^T bq:  (1, H) f32 pre-scaled bias
    att: (1, L)  f32 additive padding mask
    """
    q = (jnp.dot(xq, wqT, preferred_element_type=jnp.float32) + bq
         ).astype(jnp.bfloat16)                                        # (TQ, H)
    # NT matmul, contract over H: no in-kernel transpose of K.
    scores = lax.dot_general(q, k, (((1,), (1,)), ((), ())),
                             preferred_element_type=jnp.float32)       # (TQ, L) f32
    # Strictly-lower-triangular -1000 bias + additive padding mask, built from a
    # (TQ,1) row iota and a (1,L) col iota (broadcast compare), ~2 VPU passes.
    row = start + lax.broadcasted_iota(jnp.int32, (tq, 1), 0)          # (TQ, 1)
    col = lax.broadcasted_iota(jnp.int32, (1, seq_len), 1)             # (1, L)
    scores = jnp.where(col < row, scores - 1000.0, scores) + att
    # Numerically-stable softmax in f32; divide replaced by EUP reciprocal.
    m = jnp.max(scores, axis=-1, keepdims=True)
    e = jnp.exp(scores - m)
    inv = pl.reciprocal(jnp.sum(e, axis=-1, keepdims=True), approx=False)
    out_ref[0] = (e * inv).astype(out_ref.dtype)


def _span_attn_fused_kernel(amask_ref, x_ref, wqT_ref, bq_ref, wkT_ref, bk_ref,
                            out_ref, *scratch, seq_len, tq):
    qt = pl.program_id(1)

    if scratch:
        # nq > 1: project K once per batch element (qt == 0) and reuse it from
        # VMEM scratch for every query tile.  This is only correct because the
        # qt axis is "arbitrary" (sequential, starting at 0 for each b) — do NOT
        # mark that axis parallel while this hoist exists.
        k_scratch, = scratch

        @pl.when(qt == 0)
        def _():
            kf = jnp.dot(x_ref[0], wkT_ref[...],
                         preferred_element_type=jnp.float32) + bk_ref[...]
            k_scratch[...] = kf.astype(k_scratch.dtype)

        k = k_scratch[...]
    else:
        # nq == 1: a single query tile per batch element — no reuse possible, so
        # skip the scratch round-trip and project K inline.
        k = (jnp.dot(x_ref[0], wkT_ref[...],
                     preferred_element_type=jnp.float32) + bk_ref[...]
             ).astype(jnp.bfloat16)

    start = pl.multiple_of(qt * tq, tq)
    xq = x_ref[0, pl.ds(start, tq), :]   # slice query rows from the full-seq block
    _attend(xq, k, wqT_ref[...], bq_ref[...], amask_ref[0],
            start, tq, seq_len, out_ref)


def _span_attn_precomputed_k_kernel(amask_ref, xq_ref, k_ref, wqT_ref, bq_ref,
                                    out_ref, *, seq_len, tq):
    # K was projected outside the kernel (plain XLA bf16 matmul); every grid
    # point is independent, so both grid axes can be "parallel" (v7x dual-TC).
    qt = pl.program_id(1)
    start = pl.multiple_of(qt * tq, tq)
    _attend(xq_ref[0], k_ref[0], wqT_ref[...], bq_ref[...], amask_ref[0],
            start, tq, seq_len, out_ref)


def _pick_tq(L):
    # Prefer >= 2 query tiles (overlap output writeback with compute) and cap the
    # tile at 256 so the (TQ, L) f32 softmax temporaries + the double-buffered
    # (1, TQ, L) output tile stay comfortably inside v7x's 64 MiB VMEM.
    for t in (256, 128):
        if L % t == 0 and t < L:
            return t
    return L   # short / odd sequences: single tile equal to the full dim


def span_attention(hidden_states, active_mask, wq, bq, wk, bk, *,
                   precompute_k=False, out_dtype=jnp.float32):
    """hidden_states: [B, L, H] f32, active_mask: [B, L] (0/1) -> [B, L, L]."""
    B, L, H = hidden_states.shape
    TQ = _pick_tq(L)
    nq = L // TQ
    scale = 1.0 / math.sqrt(H)

    # Host-side prep: bf16 activations, pre-transposed weights, 1/sqrt(H) folded
    # into the Q projection so the kernel never scales the (TQ, L) score tile.
    x_bf16 = hidden_states.astype(jnp.bfloat16)
    wqT = (wq.T * scale).astype(jnp.bfloat16)
    bq2 = (bq * scale).reshape(1, H).astype(jnp.float32)
    wkT = wk.T.astype(jnp.bfloat16)
    bk2 = bk.reshape(1, H).astype(jnp.float32)
    att_add = ((1.0 - active_mask.astype(jnp.float32)) * -10000.0).reshape(B, 1, L)

    out_bytes = jnp.dtype(out_dtype).itemsize
    cost = pl.CostEstimate(
        flops=2 * B * (2 * L * H * H + L * L * H),
        transcendentals=B * L * L,
        bytes_accessed=B * (L * H * 2 + L * L * out_bytes) + 2 * H * H * 2,
    )

    def build(single_buffer_consts):
        # pipeline_mode=pl.Buffered(1): weights/biases never change block index,
        # so double-buffering them only wastes VMEM.
        cw = dict(pipeline_mode=pl.Buffered(1)) if single_buffer_consts else {}

        if precompute_k:
            kern = functools.partial(_span_attn_precomputed_k_kernel,
                                     seq_len=L, tq=TQ)
            in_specs = [
                pl.BlockSpec((1, 1, L), lambda b, qt: (b, 0, 0)),     # additive mask
                pl.BlockSpec((1, TQ, H), lambda b, qt: (b, qt, 0)),   # x query rows
                pl.BlockSpec((1, L, H), lambda b, qt: (b, 0, 0)),     # precomputed K
                pl.BlockSpec((H, H), lambda b, qt: (0, 0), **cw),     # Wq^T (scaled)
                pl.BlockSpec((1, H), lambda b, qt: (0, 0), **cw),     # bq (scaled)
            ]
            scratch = []
            semantics = ("parallel", "parallel")        # both axes independent
        else:
            kern = functools.partial(_span_attn_fused_kernel, seq_len=L, tq=TQ)
            in_specs = [
                pl.BlockSpec((1, 1, L), lambda b, qt: (b, 0, 0)),     # additive mask
                pl.BlockSpec((1, L, H), lambda b, qt: (b, 0, 0)),     # x (full seq)
                pl.BlockSpec((H, H), lambda b, qt: (0, 0), **cw),     # Wq^T (scaled)
                pl.BlockSpec((1, H), lambda b, qt: (0, 0), **cw),     # bq (scaled)
                pl.BlockSpec((H, H), lambda b, qt: (0, 0), **cw),     # Wk^T
                pl.BlockSpec((1, H), lambda b, qt: (0, 0), **cw),     # bk
            ]
            # K scratch only when there is actual reuse across query tiles.
            scratch = [pltpu.VMEM((L, H), jnp.bfloat16)] if nq > 1 else []
            semantics = ("parallel", "arbitrary")       # qt sequential: K reuse

        return pl.pallas_call(
            kern,
            out_shape=jax.ShapeDtypeStruct((B, L, L), out_dtype),
            grid_spec=pltpu.PrefetchScalarGridSpec(
                num_scalar_prefetch=0,
                grid=(B, nq),
                in_specs=in_specs,
                out_specs=pl.BlockSpec((1, TQ, L), lambda b, qt: (b, qt, 0)),
                scratch_shapes=scratch),
            compiler_params=pltpu.CompilerParams(
                dimension_semantics=semantics,
                vmem_limit_bytes=48 * 1024 * 1024),
            cost_estimate=cost,
        )

    if precompute_k:
        k_bf16 = (jnp.einsum("blh,hk->blk", x_bf16, wkT,
                             preferred_element_type=jnp.float32)
                  + bk2).astype(jnp.bfloat16)
        args = (att_add, x_bf16, k_bf16, wqT, bq2)
    else:
        args = (att_add, x_bf16, wqT, bq2, wkT, bk2)

    try:
        return build(single_buffer_consts=True)(*args)
    except Exception:
        # Older jax builds may not support pipeline_mode on pallas_call block
        # specs — retry with default double buffering (correctness unchanged).
        return build(single_buffer_consts=False)(*args)


def span_attention_ref(hidden_states, active_mask, wq, bq, wk, bk):
    """Pure-JAX f32 reference mirroring the PyTorch forward exactly."""
    B, L, H = hidden_states.shape
    active_mask = active_mask.astype(jnp.float32)
    attention_mask = (1.0 - active_mask)[:, None, :] * -10000.0               # [B,1,L]
    tril_mask = jnp.tril(jnp.full((L, L), -1000.0, jnp.float32), k=-1)[None]  # [1,L,L]
    q = hidden_states @ wq.T + bq
    k = hidden_states @ wk.T + bk
    scores = q @ jnp.swapaxes(k, -1, -2) / math.sqrt(H)
    scores = scores + attention_mask + tril_mask
    return jax.nn.softmax(scores, axis=-1)


def _run_check(B, L, H, lengths, precompute_k):
    key = jax.random.PRNGKey(0)
    k_x, k_wq, k_bq, k_wk, k_bk = jax.random.split(key, 5)

    hidden_states = jax.random.normal(k_x, (B, L, H), dtype=jnp.float32)

    # Deterministic synthetic Linear params (PyTorch-style uniform init bound).
    bound = 1.0 / math.sqrt(H)
    wq = jax.random.uniform(k_wq, (H, H), jnp.float32, -bound, bound)
    bq = jax.random.uniform(k_bq, (H,), jnp.float32, -bound, bound)
    wk = jax.random.uniform(k_wk, (H, H), jnp.float32, -bound, bound)
    bk = jax.random.uniform(k_bk, (H,), jnp.float32, -bound, bound)

    # Active mask: first `len` positions valid per batch element.
    lengths = jnp.asarray(lengths, jnp.int32)
    active_mask = (jnp.arange(L)[None, :] < lengths[:, None]).astype(jnp.float32)

    out = jax.block_until_ready(
        span_attention(hidden_states, active_mask, wq, bq, wk, bk,
                       precompute_k=precompute_k))
    ref = span_attention_ref(hidden_states, active_mask, wq, bq, wk, bk)

    assert out.shape == (B, L, L)
    # bf16 matmuls with f32 accumulation -> relaxed tolerance vs f32 reference.
    assert jnp.allclose(out, ref, atol=2e-2, rtol=2e-2), (
        f"mismatch vs reference (B={B}, L={L}, H={H}, precompute_k={precompute_k})")
    # Probability rows sum to 1.
    assert jnp.allclose(jnp.sum(out, axis=-1), 1.0, atol=1e-3), (
        f"rows not normalized (B={B}, L={L}, H={H}, precompute_k={precompute_k})")


if __name__ == "__main__":
    # Small shape consistent with the module: exercises the nq == 1 inline-K path.
    _run_check(B=2, L=8, H=32, lengths=[6, 8], precompute_k=False)
    # Multi-tile shape: exercises the per-batch K hoist into VMEM scratch (nq == 2).
    _run_check(B=2, L=256, H=64, lengths=[200, 256], precompute_k=False)
    # v7x-oriented variant: K precomputed outside, both grid axes "parallel".
    _run_check(B=2, L=256, H=64, lengths=[200, 256], precompute_k=True)
    print("KERNEL_OK")
</pallas_src>

<mosaic_0001>
module attributes {stable_mosaic.version = 11 : i64} {
  func.func @_span_attn_fused_kernel(%arg0: i32, %arg1: i32, %arg2: memref<1x1x8xf32, #tpu.memory_space<vmem>>, %arg3: memref<1x8x32xbf16, #tpu.memory_space<vmem>>, %arg4: memref<32x32xbf16, #tpu.memory_space<vmem>>, %arg5: memref<1x32xf32, #tpu.memory_space<vmem>>, %arg6: memref<32x32xbf16, #tpu.memory_space<vmem>>, %arg7: memref<1x32xf32, #tpu.memory_space<vmem>>, %arg8: memref<1x8x8xf32, #tpu.memory_space<vmem>>) attributes {dimension_semantics = [#tpu.dimension_semantics<parallel>, #tpu.dimension_semantics<arbitrary>], iteration_bounds = array<i64: 2, 1>, scalar_prefetch = 0 : i64, scratch_operands = 0 : i64, tpu.core_type = #tpu.core_type<tc>, window_params = [{transform_indices = @transform_0, window_bounds = array<i64: 1, 1, 8>}, {transform_indices = @transform_1, window_bounds = array<i64: 1, 8, 32>}, {pipeline_mode = #tpu.pipeline_mode<synchronous>, transform_indices = @transform_2, window_bounds = array<i64: 32, 32>}, {pipeline_mode = #tpu.pipeline_mode<synchronous>, transform_indices = @transform_3, window_bounds = array<i64: 1, 32>}, {pipeline_mode = #tpu.pipeline_mode<synchronous>, transform_indices = @transform_4, window_bounds = array<i64: 32, 32>}, {pipeline_mode = #tpu.pipeline_mode<synchronous>, transform_indices = @transform_5, window_bounds = array<i64: 1, 32>}, {transform_indices = @transform_6, window_bounds = array<i64: 1, 8, 8>}]} {
    %c0 = arith.constant 0 : index
    %c0_0 = arith.constant 0 : index
    %c0_1 = arith.constant 0 : index
    %0 = vector.load %arg3[%c0, %c0_0, %c0_1] : memref<1x8x32xbf16, #tpu.memory_space<vmem>>, vector<1x8x32xbf16>
    %1 = vector.shape_cast %0 : vector<1x8x32xbf16> to vector<8x32xbf16>
    %c0_2 = arith.constant 0 : index
    %c0_3 = arith.constant 0 : index
    %2 = vector.load %arg6[%c0_2, %c0_3] : memref<32x32xbf16, #tpu.memory_space<vmem>>, vector<32x32xbf16>
    %cst = arith.constant dense<0.000000e+00> : vector<8x32xf32>
    %3 = tpu.matmul %1, %2, %cst {dimension_numbers = #tpu.dot_dimension_numbers<[1], [0], [0], [1], [0, 0, 1, 1], [], []>} : vector<8x32xbf16>, vector<32x32xbf16>, vector<8x32xf32> -> vector<8x32xf32>
    %c0_4 = arith.constant 0 : index
    %c0_5 = arith.constant 0 : index
    %4 = vector.load %arg7[%c0_4, %c0_5] : memref<1x32xf32, #tpu.memory_space<vmem>>, vector<1x32xf32>
    %5 = vector.broadcast %4 : vector<1x32xf32> to vector<8x32xf32>
    %6 = arith.addf %3, %5 : vector<8x32xf32>
    %7 = arith.truncf %6 : vector<8x32xf32> to vector<8x32xbf16>
    %c8_i32 = arith.constant 8 : i32
    %8 = arith.muli %arg1, %c8_i32 : i32
    %9 = tpu.assume_multiple %8, 8 : i32
    %c0_6 = arith.constant 0 : index
    %10 = arith.index_cast %9 : i32 to index
    %c0_7 = arith.constant 0 : index
    %11 = vector.load %arg3[%c0_6, %10, %c0_7] : memref<1x8x32xbf16, #tpu.memory_space<vmem>>, vector<1x8x32xbf16>
    %12 = vector.shape_cast %11 : vector<1x8x32xbf16> to vector<8x32xbf16>
    %c0_8 = arith.constant 0 : index
    %c0_9 = arith.constant 0 : index
    %13 = vector.load %arg4[%c0_8, %c0_9] : memref<32x32xbf16, #tpu.memory_space<vmem>>, vector<32x32xbf16>
    %c0_10 = arith.constant 0 : index
    %c0_11 = arith.constant 0 : index
    %14 = vector.load %arg5[%c0_10, %c0_11] : memref<1x32xf32, #tpu.memory_space<vmem>>, vector<1x32xf32>
    %c0_12 = arith.constant 0 : index
    %c0_13 = arith.constant 0 : index
    %c0_14 = arith.constant 0 : index
    %15 = vector.load %arg2[%c0_12, %c0_13, %c0_14] : memref<1x1x8xf32, #tpu.memory_space<vmem>>, vector<1x1x8xf32>
    %16 = vector.shape_cast %15 : vector<1x1x8xf32> to vector<1x8xf32>
    %cst_15 = arith.constant dense<0.000000e+00> : vector<8x32xf32>
    %17 = tpu.matmul %12, %13, %cst_15 {dimension_numbers = #tpu.dot_dimension_numbers<[1], [0], [0], [1], [0, 0, 1, 1], [], []>} : vector<8x32xbf16>, vector<32x32xbf16>, vector<8x32xf32> -> vector<8x32xf32>
    %18 = vector.broadcast %14 : vector<1x32xf32> to vector<8x32xf32>
    %19 = arith.addf %17, %18 : vector<8x32xf32>
    %20 = arith.truncf %19 : vector<8x32xf32> to vector<8x32xbf16>
    %cst_16 = arith.constant dense<0.000000e+00> : vector<8x8xf32>
    %21 = tpu.matmul %20, %7, %cst_16 {dimension_numbers = #tpu.dot_dimension_numbers<[1], [1], [0], [0], [0, 0, 1, 0], [], []>} : vector<8x32xbf16>, vector<8x32xbf16>, vector<8x8xf32> -> vector<8x8xf32>
    %22 = tpu.iota {dimensions = array<i32: 0>} : vector<8x1xi32>
    %23 = vector.broadcast %9 : i32 to vector<8x1xi32>
    %24 = arith.addi %23, %22 : vector<8x1xi32>
    %25 = tpu.iota {dimensions = array<i32: 1>} : vector<1x8xi32>
    %26 = vector.broadcast %25 : vector<1x8xi32> to vector<8x8xi32>
    %27 = vector.broadcast %24 : vector<8x1xi32> to vector<8x8xi32>
    %28 = arith.cmpi slt, %26, %27 : vector<8x8xi32>
    %cst_17 = arith.constant 1.000000e+03 : f32
    %29 = vector.broadcast %cst_17 : f32 to vector<8x8xf32>
    %30 = arith.subf %21, %29 : vector<8x8xf32>
    %31 = arith.select %28, %30, %21 : vector<8x8xi1>, vector<8x8xf32>
    %32 = vector.broadcast %16 : vector<1x8xf32> to vector<8x8xf32>
    %33 = arith.addf %31, %32 : vector<8x8xf32>
    %cst_18 = arith.constant dense<0xFF800000> : vector<8xf32>
    %34 = vector.multi_reduction <maximumf>, %33, %cst_18 [1] : vector<8x8xf32> to vector<8xf32>
    %35 = vector.shape_cast %34 : vector<8xf32> to vector<8x1xf32>
    %36 = vector.broadcast %35 : vector<8x1xf32> to vector<8x8xf32>
    %37 = arith.subf %33, %36 : vector<8x8xf32>
    %38 = math.exp %37 : vector<8x8xf32>
    %cst_19 = arith.constant dense<0.000000e+00> : vector<8xf32>
    %39 = vector.multi_reduction <add>, %38, %cst_19 [1] : vector<8x8xf32> to vector<8xf32>
    %40 = vector.shape_cast %39 : vector<8xf32> to vector<8x1xf32>
    %41 = tpu.reciprocal %40 : vector<8x1xf32> -> vector<8x1xf32>
    %42 = vector.broadcast %41 : vector<8x1xf32> to vector<8x8xf32>
    %43 = arith.mulf %38, %42 : vector<8x8xf32>
    %c0_20 = arith.constant 0 : index
    %c0_21 = arith.constant 0 : index
    %c0_22 = arith.constant 0 : index
    %44 = vector.load %arg8[%c0_20, %c0_21, %c0_22] : memref<1x8x8xf32, #tpu.memory_space<vmem>>, vector<1x8x8xf32>
    %45 = vector.shape_cast %44 : vector<1x8x8xf32> to vector<8x8xf32>
    %46 = vector.shape_cast %43 : vector<8x8xf32> to vector<1x8x8xf32>
    tpu.vector_store %arg8[%c0_20, %c0_21, %c0_22], %46 {strides = array<i32>} : memref<1x8x8xf32, #tpu.memory_space<vmem>>, vector<1x8x8xf32>,
    return
  }
  func.func @transform_0(%arg0: i32, %arg1: i32) -> (i32, i32, i32) {
    %c0_i32 = arith.constant 0 : i32
    %c0_i32_0 = arith.constant 0 : i32
    %c0_i32_1 = arith.constant 0 : i32
    return %arg0, %c0_i32, %c0_i32_0 : i32, i32, i32
  }
  func.func @transform_1(%arg0: i32, %arg1: i32) -> (i32, i32, i32) {
    %c0_i32 = arith.constant 0 : i32
    %c0_i32_0 = arith.constant 0 : i32
    %c0_i32_1 = arith.constant 0 : i32
    return %arg0, %c0_i32, %c0_i32_0 : i32, i32, i32
  }
  func.func @transform_2(%arg0: i32, %arg1: i32) -> (i32, i32) {
    %c0_i32 = arith.constant 0 : i32
    %c0_i32_0 = arith.constant 0 : i32
    %c0_i32_1 = arith.constant 0 : i32
    return %c0_i32, %c0_i32_0 : i32, i32
  }
  func.func @transform_3(%arg0: i32, %arg1: i32) -> (i32, i32) {
    %c0_i32 = arith.constant 0 : i32
    %c0_i32_0 = arith.constant 0 : i32
    %c0_i32_1 = arith.constant 0 : i32
    return %c0_i32, %c0_i32_0 : i32, i32
  }
  func.func @transform_4(%arg0: i32, %arg1: i32) -> (i32, i32) {
    %c0_i32 = arith.constant 0 : i32
    %c0_i32_0 = arith.constant 0 : i32
    %c0_i32_1 = arith.constant 0 : i32
    return %c0_i32, %c0_i32_0 : i32, i32
  }
  func.func @transform_5(%arg0: i32, %arg1: i32) -> (i32, i32) {
    %c0_i32 = arith.constant 0 : i32
    %c0_i32_0 = arith.constant 0 : i32
    %c0_i32_1 = arith.constant 0 : i32
    return %c0_i32, %c0_i32_0 : i32, i32
  }
  func.func @transform_6(%arg0: i32, %arg1: i32) -> (i32, i32, i32) {
    %c0_i32 = arith.constant 0 : i32
    %c0_i32_0 = arith.constant 0 : i32
    return %arg0, %arg1, %c0_i32 : i32, i32, i32
  }
}

module attributes {stable_mosaic.version = 11 : i64} {
  func.func @_span_attn_fused_kernel(%arg0: i32, %arg1: i32, %arg2: memref<1x1x8xf32, #tpu.memory_space<vmem>>, %arg3: memref<1x8x32xbf16, #tpu.memory_space<vmem>>, %arg4: memref<32x32xbf16, #tpu.memory_space<vmem>>, %arg5: memref<1x32xf32, #tpu.memory_space<vmem>>, %arg6: memref<32x32xbf16, #tpu.memory_space<vmem>>, %arg7: memref<1x32xf32, #tpu.memory_space<vmem>>, %arg8: memref<1x8x8xf32, #tpu.memory_space<vmem>>) attributes {dimension_semantics = [#tpu.dimension_semantics<parallel>, #tpu.dimension_semantics<arbitrary>], iteration_bounds = array<i64: 2, 1>, scalar_prefetch = 0 : i64, scratch_operands = 0 : i64, tpu.core_type = #tpu.core_type<tc>, window_params = [{transform_indices = @transform_0, window_bounds = array<i64: 1, 1, 8>}, {transform_indices = @transform_1, window_bounds = array<i64: 1, 8, 32>}, {pipeline_mode = #tpu.pipeline_mode<synchronous>, transform_indices = @transform_2, window_bounds = array<i64: 32, 32>}, {pipeline_mode = #tpu.pipeline_mode<synchronous>, transform_indices = @transform_3, window_bounds = array<i64: 1, 32>}, {pipeline_mode = #tpu.pipeline_mode<synchronous>, transform_indices = @transform_4, window_bounds = array<i64: 32, 32>}, {pipeline_mode = #tpu.pipeline_mode<synchronous>, transform_indices = @transform_5, window_bounds = array<i64: 1, 32>}, {transform_indices = @transform_6, window_bounds = array<i64: 1, 8, 8>}]} {
    %c0 = arith.constant 0 : index
    %c0_0 = arith.constant 0 : index
    %c0_1 = arith.constant 0 : index
    %0 = vector.load %arg3[%c0, %c0_0, %c0_1] : memref<1x8x32xbf16, #tpu.memory_space<vmem>>, vector<1x8x32xbf16>
    %1 = vector.shape_cast %0 : vector<1x8x32xbf16> to vector<8x32xbf16>
    %c0_2 = arith.constant 0 : index
    %c0_3 = arith.constant 0 : index
    %2 = vector.load %arg6[%c0_2, %c0_3] : memref<32x32xbf16, #tpu.memory_space<vmem>>, vector<32x32xbf16>
    %cst = arith.constant dense<0.000000e+00> : vector<8x32xf32>
    %3 = tpu.matmul %1, %2, %cst {dimension_numbers = #tpu.dot_dimension_numbers<[1], [0], [0], [1], [0, 0, 1, 1], [], []>} : vector<8x32xbf16>, vector<32x32xbf16>, vector<8x32xf32> -> vector<8x32xf32>
    %c0_4 = arith.constant 0 : index
    %c0_5 = arith.constant 0 : index
    %4 = vector.load %arg7[%c0_4, %c0_5] : memref<1x32xf32, #tpu.memory_space<vmem>>, vector<1x32xf32>
    %5 = vector.broadcast %4 : vector<1x32xf32> to vector<8x32xf32>
    %6 = arith.addf %3, %5 : vector<8x32xf32>
    %7 = arith.truncf %6 : vector<8x32xf32> to vector<8x32xbf16>
    %c8_i32 = arith.constant 8 : i32
    %8 = arith.muli %arg1, %c8_i32 : i32
    %9 = tpu.assume_multiple %8, 8 : i32
    %c0_6 = arith.constant 0 : index
    %10 = arith.index_cast %9 : i32 to index
    %c0_7 = arith.constant 0 : index
    %11 = vector.load %arg3[%c0_6, %10, %c0_7] : memref<1x8x32xbf16, #tpu.memory_space<vmem>>, vector<1x8x32xbf16>
    %12 = vector.shape_cast %11 : vector<1x8x32xbf16> to vector<8x32xbf16>
    %c0_8 = arith.constant 0 : index
    %c0_9 = arith.constant 0 : index
    %13 = vector.load %arg4[%c0_8, %c0_9] : memref<32x32xbf16, #tpu.memory_space<vmem>>, vector<32x32xbf16>
    %c0_10 = arith.constant 0 : index
    %c0_11 = arith.constant 0 : index
    %14 = vector.load %arg5[%c0_10, %c0_11] : memref<1x32xf32, #tpu.memory_space<vmem>>, vector<1x32xf32>
    %c0_12 = arith.constant 0 : index
    %c0_13 = arith.constant 0 : index
    %c0_14 = arith.constant 0 : index
    %15 = vector.load %arg2[%c0_12, %c0_13, %c0_14] : memref<1x1x8xf32, #tpu.memory_space<vmem>>, vector<1x1x8xf32>
    %16 = vector.shape_cast %15 : vector<1x1x8xf32> to vector<1x8xf32>
    %cst_15 = arith.constant dense<0.000000e+00> : vector<8x32xf32>
    %17 = tpu.matmul %12, %13, %cst_15 {dimension_numbers = #tpu.dot_dimension_numbers<[1], [0], [0], [1], [0, 0, 1, 1], [], []>} : vector<8x32xbf16>, vector<32x32xbf16>, vector<8x32xf32> -> vector<8x32xf32>
    %18 = vector.broadcast %14 : vector<1x32xf32> to vector<8x32xf32>
    %19 = arith.addf %17, %18 : vector<8x32xf32>
    %20 = arith.truncf %19 : vector<8x32xf32> to vector<8x32xbf16>
    %cst_16 = arith.constant dense<0.000000e+00> : vector<8x8xf32>
    %21 = tpu.matmul %20, %7, %cst_16 {dimension_numbers = #tpu.dot_dimension_numbers<[1], [1], [0], [0], [0, 0, 1, 0], [], []>} : vector<8x32xbf16>, vector<8x32xbf16>, vector<8x8xf32> -> vector<8x8xf32>
    %22 = tpu.iota {dimensions = array<i32: 0>} : vector<8x1xi32>
    %23 = vector.broadcast %9 : i32 to vector<8x1xi32>
    %24 = arith.addi %23, %22 : vector<8x1xi32>
    %25 = tpu.iota {dimensions = array<i32: 1>} : vector<1x8xi32>
    %26 = vector.broadcast %25 : vector<1x8xi32> to vector<8x8xi32>
    %27 = vector.broadcast %24 : vector<8x1xi32> to vector<8x8xi32>
    %28 = arith.cmpi slt, %26, %27 : vector<8x8xi32>
    %cst_17 = arith.constant 1.000000e+03 : f32
    %29 = vector.broadcast %cst_17 : f32 to vector<8x8xf32>
    %30 = arith.subf %21, %29 : vector<8x8xf32>
    %31 = arith.select %28, %30, %21 : vector<8x8xi1>, vector<8x8xf32>
    %32 = vector.broadcast %16 : vector<1x8xf32> to vector<8x8xf32>
    %33 = arith.addf %31, %32 : vector<8x8xf32>
    %cst_18 = arith.constant dense<0xFF800000> : vector<8xf32>
    %34 = vector.multi_reduction <maximumf>, %33, %cst_18 [1] : vector<8x8xf32> to vector<8xf32>
    %35 = vector.shape_cast %34 : vector<8xf32> to vector<8x1xf32>
    %36 = vector.broadcast %35 : vector<8x1xf32> to vector<8x8xf32>
    %37 = arith.subf %33, %36 : vector<8x8xf32>
    %38 = math.exp %37 : vector<8x8xf32>
    %cst_19 = arith.constant dense<0.000000e+00> : vector<8xf32>
    %39 = vector.multi_reduction <add>, %38, %cst_19 [1] : vector<8x8xf32> to vector<8xf32>
    %40 = vector.shape_cast %39 : vector<8xf32> to vector<8x1xf32>
    %41 = tpu.reciprocal %40 : vector<8x1xf32> -> vector<8x1xf32>
    %42 = vector.broadcast %41 : vector<8x1xf32> to vector<8x8xf32>
    %43 = arith.mulf %38, %42 : vector<8x8xf32>
    %c0_20 = arith.constant 0 : index
    %c0_21 = arith.constant 0 : index
    %c0_22 = arith.constant 0 : index
    %44 = vector.load %arg8[%c0_20, %c0_21, %c0_22] : memref<1x8x8xf32, #tpu.memory_space<vmem>>, vector<1x8x8xf32>
    %45 = vector.shape_cast %44 : vector<1x8x8xf32> to vector<8x8xf32>
    %46 = vector.shape_cast %43 : vector<8x8xf32> to vector<1x8x8xf32>
    tpu.vector_store %arg8[%c0_20, %c0_21, %c0_22], %46 {strides = array<i32>} : memref<1x8x8xf32, #tpu.memory_space<vmem>>, vector<1x8x8xf32>,
    return
  }
  func.func @transform_0(%arg0: i32, %arg1: i32) -> (i32, i32, i32) {
    %c0_i32 = arith.constant 0 : i32
    %c0_i32_0 = arith.constant 0 : i32
    %c0_i32_1 = arith.constant 0 : i32
    return %arg0, %c0_i32, %c0_i32_0 : i32, i32, i32
  }
  func.func @transform_1(%arg0: i32, %arg1: i32) -> (i32, i32, i32) {
    %c0_i32 = arith.constant 0 : i32
    %c0_i32_0 = arith.constant 0 : i32
    %c0_i32_1 = arith.constant 0 : i32
    return %arg0, %c0_i32, %c0_i32_0 : i32, i32, i32
  }
  func.func @transform_2(%arg0: i32, %arg1: i32) -> (i32, i32) {
    %c0_i32 = arith.constant 0 : i32
    %c0_i32_0 = arith.constant 0 : i32
    %c0_i32_1 = arith.constant 0 : i32
    return %c0_i32, %c0_i32_0 : i32, i32
  }
  func.func @transform_3(%arg0: i32, %arg1: i32) -> (i32, i32) {
    %c0_i32 = arith.constant 0 : i32
    %c0_i32_0 = arith.constant 0 : i32
    %c0_i32_1 = arith.constant 0 : i32
    return %c0_i32, %c0_i32_0 : i32, i32
  }
  func.func @transform_4(%arg0: i32, %arg1: i32) -> (i32, i32) {
    %c0_i32 = arith.constant 0 : i32
    %c0_i32_0 = arith.constant 0 : i32
    %c0_i32_1 = arith.constant 0 : i32
    return %c0_i32, %c0_i32_0 : i32, i32
  }
  func.func @transform_5(%arg0: i32, %arg1: i32) -> (i32, i32) {
    %c0_i32 = arith.constant 0 : i32
    %c0_i32_0 = arith.constant 0 : i32
    %c0_i32_1 = arith.constant 0 : i32
    return %c0_i32, %c0_i32_0 : i32, i32
  }
  func.func @transform_6(%arg0: i32, %arg1: i32) -> (i32, i32, i32) {
    %c0_i32 = arith.constant 0 : i32
    %c0_i32_0 = arith.constant 0 : i32
    return %arg0, %arg1, %c0_i32 : i32, i32, i32
  }
}

</mosaic_0001>

<bundles_post_ra>
// kernel: tpu_custom_call.1
= control target key start
LH: loop header
LB: loop body
LE: loop exit
PB: predicated region body
PF: predicated region fallthrough
CT: control target
= control target key end

     0   :  { %s1423_s0 = inlined_call_operand.hbm [shape: f32[2,1,8], index: 0, kind: input, shape index: {}]   ;;  %s1424_s1 = inlined_call_operand.hbm [shape: bf16[2,8,32], index: 1, kind: input, shape index: {}]   ;;  %s1425_s2 = inlined_call_operand.hbm [shape: bf16[32,32], index: 2, kind: input, shape index: {}]   ;;  %s1426_s3 = inlined_call_operand.vmem [shape: f32[1,32], index: 3, kind: input, shape index: {}]   ;;  %s1427_s4 = inlined_call_operand.hbm [shape: bf16[32,32], index: 4, kind: input, shape index: {}]   ;;  %s1428_s5 = inlined_call_operand.vmem [shape: f32[1,32], index: 5, kind: input, shape index: {}]   ;;  %s1429_s6 = inlined_call_operand.hbm [shape: f32[2,8,8], index: 6, kind: output, shape index: {}]  }
   0x1   :  { %1435 = sst [smem:[#allocation17_spill]] %s1423_s0 }
   0x2   :  { %1436 = sst [smem:[#allocation18_spill]] %s1425_s2 }
   0x3   :  { %1437 = sst [smem:[#allocation19_spill]] %s1427_s4 }
   0x4   :  { %11 = vsyncpa [#allocation3], 0 }
   0x5   :  { %13 = vsyncpa [#allocation3 + $0x1], 0 }
   0x6   :  { %14 = vsyncpa [#allocation6], 0 }
   0x7   :  { %16 = vsyncpa [#allocation6 + $0x1], 0 }
   0x8   :  { %17 = vsyncpa [#allocation9], 0 }
   0x9   :  { %18 = vsyncpa [#allocation4], 0 }
   0xa   :  { %20 = vsyncpa [#allocation4 + $0x1], 0  ;;  %s1113_s21 = smov 0   ;;  %s1115_s22 = smov 0  }
   0xb   :  { %s1117_s23 = smov 0   ;;  %s1119_s24 = smov 0  }
   0xc   :  { %s1121_s25 = smov 0   ;;  %s1123_s26 = smov 0  }
   0xd LB: > { %s1144_s27 = sadd.s32 4294967295, %s1067_s26   ;;  %s699_s28 = sadd.s32 4294967294, %s1067_s26   ;;  %s1067_s26 = sphi %s1123_s26, %s26_s26   ;;  %s1063_s25 = sphi %s1121_s25, %s1464_s25   ;;  %s1059_s24 = sphi %s1119_s24, %s1463_s24   ;;  %s1055_s23 = sphi %s1117_s23, %s1462_s23   ;;  %s1051_s22 = sphi %s1115_s22, %s1461_s22   ;;  %s1047_s21 = sphi %s1113_s21, %s1460_s21  }
   0xe   : > { %p58_p0 = scmp.ne.s32.totalorder %s1051_s22, %s1047_s21  ;;  %p1430_p1 = scmp.eq.s32.totalorder %s1144_s27, 0 }
   0xf   : > { %p200_p3 = scmp.eq.s32.totalorder %s699_s28, 1  ;;  %p700_p5 = scmp.ge.s32.totalorder %s1067_s26, 1 }
  0x10   : > { %p1153_p4 = por %p1430_p1, %p58_p0  ;;  %p207_p7 = scmp.lt.s32.totalorder %s1067_s26, 3 }
  0x11   : > { %p1158_p6 = por %p200_p3, %p58_p0  ;;  %s1069_s8 = smov [#allocation7]  }
  0x12   : > { %s1438_s29 = scalar_select %p1153_p4, 1, 0 }
  0x13   : > { %s1439_s30 = scalar_select %p1158_p6, 1, 0 }
  0x14   : > { %p1163_p8 = pnand %p700_p5, %p207_p7  ;;  %s219_s9 = sshll.u32 %s1069_s8, 4  ;;  %s1167_s9 = int_to_ptr.vmem [resolvable:$true] %s219_s9 }
  0x15   : > { %s1070_s11 = smov [#allocation8]   ;;  %s1442_s2 = sld [smem:[#allocation18_spill]] }
  0x16   : > { %s1440_s7 = scalar_select %p1163_p8, 1, 0 }
  0x17   : > { %p771_p9 = pneg %p1163_p8  ;;  %s235_s12 = sshll.u32 %s1070_s11, 4  ;;  %s1178_s12 = int_to_ptr.vmem [resolvable:$true] %s235_s12 }
  0x19   : > { %p1174_p11 = pnand %p771_p9, %p1430_p1 }
  0x1b   : > { %s857_s15 = scalar_lea.hbm %s1442_s2, 256  ;;  %p859_p13 = pneg %p1174_p11 }
  0x1c   : > { %p858_p12 = scmp.ne.s32.totalorder %s1442_s2, %s857_s15  ;;  %p864_p5 = scmp.lt.u32.totalorder %s857_s15, %s1442_s2 }
  0x1e   : > { %p860_p0 = pnand %p859_p13, %p858_p12 }
  0x20   : > { %p861_p3 = pneg %p860_p0 }
  0x22   : > { %p866_p7 = pnand %p864_p5, %p861_p3 }
  0x24   : > { %869 = shalt.err (!%p866_p7)
}
  0x25   : > { %s870_s20 = scalar_lea.vmem %s1167_s9, 256  ;;  %p878_p2 = scmp.lt.s32.totalorder %s1167_s9, %s1167_s9 }
  0x26   : > { %p871_p9 = scmp.ne.s32.totalorder %s1167_s9, %s870_s20  ;;  %p879_p12 = scmp.lt.s32.totalorder %s870_s20, %s870_s20 }
  0x28   : > { %p873_p10 = pnand %p871_p9, %p859_p13  ;;  %p880_p0 = por %p879_p12, %p878_p2 }
  0x2a   : > { %p874_p1 = pneg %p873_p10 }
  0x2c   : > { %p881_p6 = pnand %p880_p0, %p874_p1 }
  0x2e   : > { %884 = shalt.err (!%p881_p6)
}
  0x2f   : > { %s1071_s28 = smov 64   ;;  %s1072_s8 = smov 4  }
  0x30   : > { %774 = dma.hbm_to_vmem [thread:$0]  (!%p1174_p11), %s1442_s2, 256, %s1167_s9, [#allocation6], %s1071_s28, %s1071_s28, %s1072_s8  }
  0x31   : > { %s1443_s4 = sld [smem:[#allocation19_spill]] }
  0x37   : > { %s885_s16 = scalar_lea.hbm %s1443_s4, 256 }
  0x38   : > { %p886_p2 = scmp.ne.s32.totalorder %s1443_s4, %s885_s16  ;;  %p892_p10 = scmp.lt.u32.totalorder %s885_s16, %s1443_s4 }
  0x3a   : > { %p888_p1 = pnand %p886_p2, %p859_p13 }
  0x3c   : > { %p889_p6 = pneg %p888_p1 }
  0x3e   : > { %p894_p3 = pnand %p892_p10, %p889_p6 }
  0x40   : > { %897 = shalt.err (!%p894_p3)
}
  0x41   : > { %s898_s9 = scalar_lea.vmem %s1178_s12, 256  ;;  %p906_p12 = scmp.lt.s32.totalorder %s1178_s12, %s1178_s12 }
  0x42   : > { %p899_p5 = scmp.ne.s32.totalorder %s1178_s12, %s898_s9  ;;  %p907_p0 = scmp.lt.s32.totalorder %s898_s9, %s898_s9 }
  0x44   : > { %p901_p7 = pnand %p899_p5, %p859_p13  ;;  %p908_p2 = por %p907_p0, %p906_p12 }
  0x46   : > { %p902_p9 = pneg %p901_p7 }
  0x48   : > { %p909_p1 = pnand %p908_p2, %p902_p9 }
  0x4a   : > { %912 = shalt.err (!%p909_p1)
}
  0x4b   : > { %777 = dma.hbm_to_vmem [thread:$0]  (!%p1174_p11), %s1443_s4, 256, %s1178_s12, [#allocation9], %s1071_s28, %s1071_s28, %s1072_s8  }
  0x4c   : > { %s38_s14 = sadd.s32 1, %s1063_s25  ;;  %s45_s15 = sadd.s32 1, %s1055_s23 }
  0x4d   : > { %p40_p13 = scmp.ge.s32.totalorder %s38_s14, 2  ;;  %p52_p6 = scmp.ne.s32.totalorder %s1055_s23, %s1051_s22 }
  0x4e   : > { %p53_p10 = scmp.eq.s32.totalorder %s1067_s26, 0  ;;  %p791_p3 = scmp.lt.s32.totalorder %s1067_s26, 2 }
  0x4f   : > { %s1466_s14 = smov (%p40_p13, %s38_s14), 0  ;;  %p1445_p7 = scmp.eq.s32.totalorder %s1144_s27, 1 }
  0x50   : > { %1444 = sst [smem:[#allocation16_spill]] %s1466_s14  ;;  %p54_p5 = por %p53_p10, %p52_p6 }
  0x51   : > { %p1242_p9 = por %p1445_p7, %p52_p6  ;;  %s42_s16 = ssub.s32 %s1063_s25, %s1466_s14 }
  0x52   : > { %s1249_s17 = sand.u32 1, %s1055_s23   ;;  %p43_p11 = scmp.eq.s32.totalorder %s42_s16, 0 }
  0x53   : > { %s1446_s10 = scalar_select %p1242_p9, 1, 0 }
  0x54   : > { %s704_s12 = sshll.u32 %s1063_s25, 4  ;;  %s1447_s0 = sld [smem:[#allocation17_spill]] }
  0x55   : > { %s1253_s28 = scalar_select %p43_p11, %s1055_s23, %s45_s15  }
  0x56   : > { %s255_s20 = scalar_lea.vmem [#allocation2], %s1249_s17  ;;  %p1265_p12 = pnand %p791_p3, %p54_p5 }
  0x57   : > { %s262_s9 = sshll.u32 %s255_s20, 4  ;;  %s705_s15 = sshll.u32 %s1249_s17, 2  ;;  %s1261_s9 = int_to_ptr.vmem [resolvable:$true] %s262_s9 }
  0x58   : > { %s253_s16 = scalar_lea.sflag [#allocation3], %s1249_s17  ;;  %p915_p2 = pneg %p1265_p12 }
  0x5a   : > { %s1258_s19 = scalar_lea.hbm %s1447_s0, %s704_s12  ;;  %s918_s20 = scalar_lea.hbm %s1447_s0, 32 }
  0x5b   : > { %s913_s12 = scalar_lea.hbm %s1258_s19, 16  ;;  %p919_p6 = scmp.lt.u32.totalorder %s1258_s19, %s1447_s0 }
  0x5c   : > { %p914_p0 = scmp.ne.s32.totalorder %s1258_s19, %s913_s12  ;;  %p920_p10 = scmp.lt.u32.totalorder %s918_s20, %s913_s12 }
  0x5d   : > { %p922_p5 = scmp.lt.u32.totalorder %s913_s12, %s1258_s19 }
  0x5e   : > { %p916_p1 = pnand %p915_p2, %p914_p0  ;;  %p921_p3 = por %p920_p10, %p919_p6 }
  0x60   : > { %p917_p13 = pneg %p916_p1  ;;  %p923_p7 = por %p922_p5, %p921_p3 }
  0x62   : > { %p924_p11 = pnand %p923_p7, %p917_p13 }
  0x64   : > { %927 = shalt.err (!%p924_p11)
}
  0x65   : > { %s928_s13 = scalar_lea.vmem %s1261_s9, 16  ;;  %s1073_s8 = smov [#allocation2]  }
  0x66   : > { %p929_p0 = scmp.ne.s32.totalorder %s1261_s9, %s928_s13  ;;  %s933_s18 = sshll.u32 %s1073_s8, 4  ;;  %s934_s18 = int_to_ptr.vmem [resolvable:$false] %s933_s18 }
  0x67   : > { %s935_s2 = scalar_lea.vmem %s934_s18, 32  ;;  %p936_p4 = scmp.lt.s32.totalorder %s1261_s9, %s934_s18 }
  0x68   : > { %p931_p1 = pnand %p929_p0, %p915_p2  ;;  %p937_p6 = scmp.lt.s32.totalorder %s935_s2, %s928_s13 }
  0x6a   : > { %p932_p9 = pneg %p931_p1  ;;  %p938_p10 = por %p937_p6, %p936_p4 }
  0x6c   : > { %p939_p3 = pnand %p938_p10, %p932_p9 }
  0x6e   : > { %942 = shalt.err (!%p939_p3)
}
  0x6f   : > { %781 = dma.hbm_to_vmem [thread:$0]  (!%p1265_p12), %s1258_s19, 16, %s1261_s9, %s253_s16  }
  0x70   : > { %s706_s4 = sshll.u32 %s1063_s25, 6  ;;  %s273_s13 = scalar_lea.vmem [#allocation5], %s705_s15 }
  0x71   : > { %s1301_s8 = scalar_lea.hbm %s1424_s1, %s706_s4  ;;  %s280_s18 = sshll.u32 %s273_s13, 4  ;;  %s281_s18 = int_to_ptr.vmem [resolvable:$true] %s280_s18 }
  0x72   : > { %s1449_s2 = sand.u32 1, %s1067_s26   ;;  %s943_s14 = scalar_lea.hbm %s1301_s8, 64 }
  0x73   : > { %s270_s0 = scalar_lea.sflag [#allocation6], %s1449_s2  ;;  %p944_p4 = scmp.ne.s32.totalorder %s1301_s8, %s943_s14 }
  0x74   : > { %s948_s16 = scalar_lea.hbm %s1424_s1, 128  ;;  %p949_p5 = scmp.lt.u32.totalorder %s1301_s8, %s1424_s1 }
  0x75   : > { %p946_p9 = pnand %p944_p4, %p915_p2  ;;  %p950_p7 = scmp.lt.u32.totalorder %s948_s16, %s943_s14 }
  0x76   : > { %p952_p0 = scmp.lt.u32.totalorder %s943_s14, %s1301_s8 }
  0x77   : > { %p947_p13 = pneg %p946_p9  ;;  %p951_p11 = por %p950_p7, %p949_p5 }
  0x79   : > { %p953_p1 = por %p952_p0, %p951_p11 }
  0x7b   : > { %p954_p6 = pnand %p953_p1, %p947_p13 }
  0x7d   : > { %957 = shalt.err (!%p954_p6)
}
  0x7e   : > { %s958_s15 = scalar_lea.vmem %s281_s18, 64  ;;  %s1074_s12 = smov [#allocation5]  }
  0x7f   : > { %p959_p10 = scmp.ne.s32.totalorder %s281_s18, %s958_s15  ;;  %s963_s20 = sshll.u32 %s1074_s12, 4  ;;  %s964_s20 = int_to_ptr.vmem [resolvable:$false] %s963_s20 }
  0x80   : > { %s965_s13 = scalar_lea.vmem %s964_s20, 128  ;;  %p966_p9 = scmp.lt.s32.totalorder %s281_s18, %s964_s20 }
  0x81   : > { %p961_p3 = pnand %p959_p10, %p915_p2  ;;  %p967_p8 = scmp.lt.s32.totalorder %s965_s13, %s958_s15 }
  0x83   : > { %p962_p4 = pneg %p961_p3  ;;  %p968_p5 = por %p967_p8, %p966_p9 }
  0x85   : > { %p969_p7 = pnand %p968_p5, %p962_p4 }
  0x87   : > { %972 = shalt.err (!%p969_p7)
}
  0x88   : > { %784 = dma.hbm_to_vmem [thread:$0]  (!%p1265_p12), %s1301_s8, 64, %s281_s18, %s270_s0  }
  0x89   : > { %p1450_p13 = scmp.ne.s32.totalorder %s1440_s7, 0 }
  0x8a   : > { %s1329_s14 = sand.u32 (!%p1450_p13), 1, %s1051_s22   ;;  %p1451_p2 = scmp.ne.s32.totalorder (!%p1450_p13), %s1438_s29, 0 }
  0x8b   : > { %289 = sbr.rel (%p1450_p13) target bundleno = 935 (0x3a7), region = 44  ;;  %s292_s2 = scalar_lea.sflag (!%p1450_p13), [#allocation3], %s1329_s14 }
  0x8c   : > { %s294_s19 = scalar_lea.vmem (!%p1450_p13), [#allocation2], %s1329_s14 }
  0x92   : > { %1026 = dma.done.wait (%p1451_p2), %s292_s2, 16  }
  0x93   : > { %1028 = vsyncadd (%p1451_p2), %s292_s2, 4294967280  ;;  %s299_s0 = sand.u32 1, %s1144_s27   ;;  %s708_s11 = sshll.u32 %s1329_s14, 2 }
  0x94   : > { %s300_s7 = scalar_lea.sflag [#allocation6], %s299_s0  ;;  %s303_s8 = scalar_lea.vmem [#allocation5], %s708_s11 }
  0x95   : > { %1030 = dma.done.wait (%p1451_p2), %s300_s7, 64  }
  0x96   : > { %1032 = vsyncadd (%p1451_p2), %s300_s7, 4294967232  ;;  %p1452_p8 = scmp.eq.s32.totalorder %s1144_s27, 0 }
  0x98   : > { %1034 = dma.done.wait (%p1452_p8), [#allocation6], 256   ;;  %p1453_p12 = pmov %p1452_p8 }
  0x99   : > { %p1454_p11 = pmov %p1452_p8 }
  0x9a   : > { %1036 = vsyncadd (%p1453_p12), [#allocation6], 4294967040 }
  0x9b   : > { %1038 = dma.done.wait (%p1454_p11), [#allocation9], 256   ;;  %p1455_p0 = pmov %p1452_p8 }
  0x9c   : > { %v1075_v0 = vmov 0.0   ;;  %vm1076_vm0 = vmmov 0   ;;  %v849_v1 = vld [vmem:[#allocation8] sm:$0xff]   ;;  %v850_v2 = vld [vmem:[#allocation8 + $0x8] sm:$0xff]   ;;  %v851_v3 = vld [vmem:[#allocation7] sm:$0xff]   ;;  %vm369_vm1 = vcmask 261120   ;;  %v534_v22 = vlaneseq }
  0x9d   : > { %1040 = vsyncadd (%p1455_p0), [#allocation9], 4294967040  ;;  %735 = vmatprep.subr.bf16.mxu0 %v1075_v0  ;;  %743 = vmatprep.subr.bf16.mxu1 %v1075_v0  ;;  %v852_v4 = vld [vmem:[#allocation7 + $0x8] sm:$0xff]   ;;  %v345_v5 = vld [vmem:[%s303_s8] sm:$0xf]  ;;  %vm550_vm3 = vcmask 64512  }
  0x9e   : > { %739 = vmatprep.mubr.msk.bf16.mxu0 %vm1076_vm0, %v1075_v0  ;;  %747 = vmatprep.mubr.msk.bf16.mxu1 %vm1076_vm0, %v1075_v0  ;;  %v419_v6 = vld [vmem:[%s303_s8] sm:$0xf]  ;;  %v712_v7 = vld [vmem:[%s1428_s5] ss:$0 sm:$0xff]  ;;  %v535_v23 = vshrl.u32 %v534_v22, 7  ;;  %v539_v24 = vand.u32 127, %v534_v22 }
  0x9f   : > { %736 = vmatpush3.bf16.msra.mxu0 %v849_v1  ;;  %744 = vmatpush3.bf16.msra.mxu1 %v851_v3  ;;  %v716_v12 = vld [vmem:[%s1426_s3] ss:$0 sm:$0xff]  ;;  %s711_s16 = sshll.u32 %s1329_s14, 3  ;;  %s724_s17 = sshll.u32 %s1059_s24, 7 }
  0xa0   : > { %737 = vmatprep.subr.bf16.mxu0 %v1075_v0  ;;  %745 = vmatprep.subr.bf16.mxu1 %v1075_v0  ;;  %vm540_vm2 = vcmp.lt.s32.totalorder %v539_v24, %v535_v23  ;;  %v722_v28 = vld [vmem:[%s294_s19] ss:$0 sm:$0xff]  ;;  %s343_s4 = scalar_lea.vmem [#allocation10], %s711_s16  ;;  %s1373_s13 = scalar_lea.hbm %s1429_s6, %s724_s17 }
  0xa1   : > { %s578_s15 = sshll.u32 %s343_s4, 4  ;;  %s564_s2 = scalar_lea.sflag [#allocation4], %s1329_s14  ;;  %s1375_s15 = int_to_ptr.vmem [resolvable:$true] %s578_s15 }
  0xa2   : > { %s973_s19 = scalar_lea.vmem %s1375_s15, 128  ;;  %p1456_p6 = scmp.ne.s32.totalorder %s1446_s10, 0 }
  0xa3   : > { %738 = vmatpush3.bf16.msra.mxu0 %v850_v2  ;;  %746 = vmatpush3.bf16.msra.mxu1 %v852_v4  ;;  %p974_p1 = scmp.ne.s32.totalorder %s1375_s15, %s973_s19  ;;  %s1077_s24 = smov [#allocation10]  }
  0xa4   : > { %751 = vmatprep.subr.bf16.mxu0 %v1075_v0  ;;  %s977_s0 = sshll.u32 %s1077_s24, 4  ;;  %s978_s0 = int_to_ptr.vmem [resolvable:$false] %s977_s0 }
  0xa5   : > { %p975_p10 = pnand %p974_p1, %p1456_p6  ;;  %s979_s11 = scalar_lea.vmem %s978_s0, 256 }
  0xa6   : > { %740 = vmatmul.mubr.msk.bf16.vlgmr.msra.gmra.mrb[0].mxu0 %vm369_vm1, %v345_v5  ;;  %748 = vmatmul.mubr.msk.bf16.vlgmr.msra.gmra.mrb[0].mxu1 %vm369_vm1, %v419_v6  ;;  %p980_p4 = scmp.lt.s32.totalorder %s1375_s15, %s978_s0  ;;  %p981_p9 = scmp.lt.s32.totalorder %s979_s11, %s973_s19 }
  0xa7   : > { %753 = vmatprep.mubr.msk.bf16.mxu0 %vm1076_vm0, %v1075_v0  ;;  %p976_p3 = pneg %p975_p10 }
  0xa8   : > { %p982_p5 = por %p981_p9, %p980_p4 }
  0xaa   : > { %p983_p7 = pnand %p982_p5, %p976_p3 }
 0x179   : > { %v407_v8 = vpop.f32.mrb[0].mxu0  ;;  %v481_v13 = vpop.f32.mrb[0].mxu1 }
 0x17a   : > { %v408_v9 = vadd.f32 %v712_v7, %v407_v8  ;;  %v741_v10 = vpop.f32.mrb[1].mxu0  ;;  %v749_v16 = vpop.f32.mrb[1].mxu1  ;;  %v482_v19 = vadd.f32 %v716_v12, %v481_v13 }
 0x17b   : > { %v410_v11 = vpop.f32.mrb[2].mxu0  ;;  %v484_v17 = vpop.f32.mrb[2].mxu1 }
 0x17c   : > { %v413_v14 = vpack.c.bf16 %v408_v9, %v408_v9  ;;  %v742_v15 = vpop.f32.mrb[3].mxu0  ;;  %v750_v20 = vpop.f32.mrb[3].mxu1  ;;  %v487_v21 = vpack.c.bf16 %v482_v19, %v482_v19 }
 0x17e   : > { %v492_v18 = vsel %vm369_vm1, %v413_v14, 0 }
 0x17f   : > { %752 = vmatpush3.bf16.xpose.msra.mxu0 %v492_v18 }
 0x186   : > { %754 = vmatmul.mubr.msk.bf16.vlgmr.msra.gmra.mrb[4].mxu0 %vm369_vm1, %v487_v21 }
 0x259   : > { %v528_v25 = vpop.f32.mrb[4].mxu0 }
 0x25a   : > { %v721_v26 = vadd.f32 -1000.0, %v528_v25  ;;  %v755_v27 = vpop.f32.mrb[5].mxu0 }
 0x25b   : > { %v531_v29 = vpop.f32.mrb[6].mxu0 }
 0x25c   : > { %v542_v30 = vsel %vm540_vm2, %v721_v26, %v528_v25  ;;  %v756_v31 = vpop.f32.mrb[7].mxu0 }
 0x25d   : > { %v549_v32 = vadd.f32 %v722_v28, %v542_v30 }
 0x25f   : > { %v551_v33 = vsel %vm550_vm3, %v549_v32, -inf }
 0x260   : > { %552 = vmax.xlane.f32.xlu0 %v551_v33 }
 0x2ed   : > { %v553_v34 = vpop.xlane.xlu0 %552 }
 0x2ee   : > { %v554_v35 = vsub.f32 %v549_v32, %v553_v34 }
 0x2f0   : > { %v555_v36 = vmul.f32 1.442695, %v554_v35 }
 0x2f2   : > { %853 = vpow2.f32 %v555_v36 }
 0x2fc   : > { %v854_v37 = vpop.eup %853 }
 0x2fd   : > { %v557_v38 = vsel %vm550_vm3, %v854_v37, 0.0 }
 0x2fe   : > { %558 = vadd.xlane.f32.xlu0 %v557_v38 }
 0x38b   : > { %v559_v39 = vpop.xlane.xlu0 %558 }
 0x38c   : > { %855 = vrcp.f32 %v559_v39 }
 0x396   : > { %v856_v40 = vpop.eup %855 }
 0x397   : > { %v561_v41 = vmul.f32 %v856_v40, %v854_v37 }
 0x399   : > { %562 = vst.msk [vmem:[%s343_s4] sm:$0xff] %vm550_vm3, %v561_v41 }
 0x39a   : > { %986 = shalt.err (!%p983_p7)
}
 0x39b   : > { %s987_s14 = scalar_lea.hbm %s1373_s13, 128  ;;  %s991_s27 = scalar_lea.hbm %s1429_s6, 256 }
 0x39c   : > { %p988_p13 = scmp.ne.s32.totalorder %s1373_s13, %s987_s14  ;;  %p992_p12 = scmp.lt.u32.totalorder %s1373_s13, %s1429_s6 }
 0x39d   : > { %p993_p11 = scmp.lt.u32.totalorder %s991_s27, %s987_s14  ;;  %p995_p1 = scmp.lt.u32.totalorder %s987_s14, %s1373_s13 }
 0x39e   : > { %p989_p2 = pnand %p988_p13, %p1456_p6 }
 0x39f   : > { %p994_p0 = por %p993_p11, %p992_p12 }
 0x3a0   : > { %p990_p8 = pneg %p989_p2 }
 0x3a1   : > { %p996_p10 = por %p995_p1, %p994_p0 }
 0x3a3   : > { %p997_p3 = pnand %p996_p10, %p990_p8 }
 0x3a5   : > { %1000 = shalt.err (!%p997_p3)
}
 0x3a6   : > { %769 = dma.vmem_to_hbm [thread:$0]  (%p1456_p6), %s1375_s15, 128, %s1373_s13, %s564_s2  }
 0x3a7 PF: > { %s590_s9 = sand.u32 1, %s1047_s21   ;;  %p1457_p4 = scmp.ne.s32.totalorder %s1439_s30, 0 }
 0x3a8   : > { %p1458_p9 = scmp.ge.s32.totalorder %s1067_s26, 2  ;;  %s591_s16 = scalar_lea.sflag [#allocation4], %s590_s9 }
 0x3aa   : > { %p786_p5 = pnand %p1458_p9, %p1457_p4 }
 0x3ac   : > { %1042 = dma.done.wait (!%p786_p5), %s591_s16, 128  }
 0x3ad   : > { %1044 = vsyncadd (!%p786_p5), %s591_s16, 4294967168  ;;  %s26_s26 = sadd.s32 1, %s1067_s26   ;;  %s1459_s10 = sld [smem:[#allocation16_spill]] }
 0x3ae   : > { %p23_p7 = scmp.ge.s32.totalorder %s26_s26, 4   ;;  %s1460_s21 = smov %s1051_s22 }
 0x3af   : > { %s1461_s22 = smov %s1055_s23  ;;  %s1462_s23 = smov %s1253_s28 }
 0x3b0   : > { %s1463_s24 = smov %s1063_s25  ;;  %25 = sbr.rel (!%p23_p7) target bundleno = 13 (0xd), region = 111 }
 0x3b3   : > { %s1464_s25 = smov %s1459_s10 }
 0x3b7   :  { %596 = vsyncpa [#allocation3], 1 }
 0x3b8   :  { %598 = vsyncpa [#allocation3 + $0x1], 1 }
 0x3b9   :  { %599 = vsyncpa [#allocation6], 1 }
 0x3ba   :  { %601 = vsyncpa [#allocation6 + $0x1], 1 }
 0x3bb   :  { %602 = vsyncpa [#allocation9], 1 }
 0x3bc   :  { %603 = vsyncpa [#allocation4], 1 }
 0x3bd   :  { %605 = vsyncpa [#allocation4 + $0x1], 1 }

// kernel: tpu_custom_call.1
= control target key start
LH: loop header
LB: loop body
LE: loop exit
PB: predicated region body
PF: predicated region fallthrough
CT: control target
= control target key end

     0   :  { %s1423_s0 = inlined_call_operand.hbm [shape: f32[2,1,8], index: 0, kind: input, shape index: {}]   ;;  %s1424_s1 = inlined_call_operand.hbm [shape: bf16[2,8,32], index: 1, kind: input, shape index: {}]   ;;  %s1425_s2 = inlined_call_operand.hbm [shape: bf16[32,32], index: 2, kind: input, shape index: {}]   ;;  %s1426_s3 = inlined_call_operand.vmem [shape: f32[1,32], index: 3, kind: input, shape index: {}]   ;;  %s1427_s4 = inlined_call_operand.hbm [shape: bf16[32,32], index: 4, kind: input, shape index: {}]   ;;  %s1428_s5 = inlined_call_operand.vmem [shape: f32[1,32], index: 5, kind: input, shape index: {}]   ;;  %s1429_s6 = inlined_call_operand.hbm [shape: f32[2,8,8], index: 6, kind: output, shape index: {}]  }
   0x1   :  { %1435 = sst [smem:[#allocation17_spill]] %s1423_s0 }
   0x2   :  { %1436 = sst [smem:[#allocation18_spill]] %s1425_s2 }
   0x3   :  { %1437 = sst [smem:[#allocation19_spill]] %s1427_s4 }
   0x4   :  { %11 = vsyncpa [#allocation3], 0 }
   0x5   :  { %13 = vsyncpa [#allocation3 + $0x1], 0 }
   0x6   :  { %14 = vsyncpa [#allocation6], 0 }
   0x7   :  { %16 = vsyncpa [#allocation6 + $0x1], 0 }
   0x8   :  { %17 = vsyncpa [#allocation9], 0 }
   0x9   :  { %18 = vsyncpa [#allocation4], 0 }
   0xa   :  { %20 = vsyncpa [#allocation4 + $0x1], 0  ;;  %s1113_s21 = smov 0   ;;  %s1115_s22 = smov 0  }
   0xb   :  { %s1117_s23 = smov 0   ;;  %s1119_s24 = smov 0  }
   0xc   :  { %s1121_s25 = smov 0   ;;  %s1123_s26 = smov 0  }
   0xd LB: > { %s1144_s27 = sadd.s32 4294967295, %s1067_s26   ;;  %s699_s28 = sadd.s32 4294967294, %s1067_s26   ;;  %s1067_s26 = sphi %s1123_s26, %s26_s26   ;;  %s1063_s25 = sphi %s1121_s25, %s1464_s25   ;;  %s1059_s24 = sphi %s1119_s24, %s1463_s24   ;;  %s1055_s23 = sphi %s1117_s23, %s1462_s23   ;;  %s1051_s22 = sphi %s1115_s22, %s1461_s22   ;;  %s1047_s21 = sphi %s1113_s21, %s1460_s21  }
   0xe   : > { %p58_p0 = scmp.ne.s32.totalorder %s1051_s22, %s1047_s21  ;;  %p1430_p1 = scmp.eq.s32.totalorder %s1144_s27, 0 }
   0xf   : > { %p200_p3 = scmp.eq.s32.totalorder %s699_s28, 1  ;;  %p700_p5 = scmp.ge.s32.totalorder %s1067_s26, 1 }
  0x10   : > { %p1153_p4 = por %p1430_p1, %p58_p0  ;;  %p207_p7 = scmp.lt.s32.totalorder %s1067_s26, 3 }
  0x11   : > { %p1158_p6 = por %p200_p3, %p58_p0  ;;  %s1069_s8 = smov [#allocation7]  }
  0x12   : > { %s1438_s29 = scalar_select %p1153_p4, 1, 0 }
  0x13   : > { %s1439_s30 = scalar_select %p1158_p6, 1, 0 }
  0x14   : > { %p1163_p8 = pnand %p700_p5, %p207_p7  ;;  %s219_s9 = sshll.u32 %s1069_s8, 4  ;;  %s1167_s9 = int_to_ptr.vmem [resolvable:$true] %s219_s9 }
  0x15   : > { %s1070_s11 = smov [#allocation8]   ;;  %s1442_s2 = sld [smem:[#allocation18_spill]] }
  0x16   : > { %s1440_s7 = scalar_select %p1163_p8, 1, 0 }
  0x17   : > { %p771_p9 = pneg %p1163_p8  ;;  %s235_s12 = sshll.u32 %s1070_s11, 4  ;;  %s1178_s12 = int_to_ptr.vmem [resolvable:$true] %s235_s12 }
  0x19   : > { %p1174_p11 = pnand %p771_p9, %p1430_p1 }
  0x1b   : > { %s857_s15 = scalar_lea.hbm %s1442_s2, 256  ;;  %p859_p13 = pneg %p1174_p11 }
  0x1c   : > { %p858_p12 = scmp.ne.s32.totalorder %s1442_s2, %s857_s15  ;;  %p864_p5 = scmp.lt.u32.totalorder %s857_s15, %s1442_s2 }
  0x1e   : > { %p860_p0 = pnand %p859_p13, %p858_p12 }
  0x20   : > { %p861_p3 = pneg %p860_p0 }
  0x22   : > { %p866_p7 = pnand %p864_p5, %p861_p3 }
  0x24   : > { %869 = shalt.err (!%p866_p7)
}
  0x25   : > { %s870_s20 = scalar_lea.vmem %s1167_s9, 256  ;;  %p878_p2 = scmp.lt.s32.totalorder %s1167_s9, %s1167_s9 }
  0x26   : > { %p871_p9 = scmp.ne.s32.totalorder %s1167_s9, %s870_s20  ;;  %p879_p12 = scmp.lt.s32.totalorder %s870_s20, %s870_s20 }
  0x28   : > { %p873_p10 = pnand %p871_p9, %p859_p13  ;;  %p880_p0 = por %p879_p12, %p878_p2 }
  0x2a   : > { %p874_p1 = pneg %p873_p10 }
  0x2c   : > { %p881_p6 = pnand %p880_p0, %p874_p1 }
  0x2e   : > { %884 = shalt.err (!%p881_p6)
}
  0x2f   : > { %s1071_s28 = smov 64   ;;  %s1072_s8 = smov 4  }
  0x30   : > { %774 = dma.hbm_to_vmem [thread:$0]  (!%p1174_p11), %s1442_s2, 256, %s1167_s9, [#allocation6], %s1071_s28, %s1071_s28, %s1072_s8  }
  0x31   : > { %s1443_s4 = sld [smem:[#allocation19_spill]] }
  0x37   : > { %s885_s16 = scalar_lea.hbm %s1443_s4, 256 }
  0x38   : > { %p886_p2 = scmp.ne.s32.totalorder %s1443_s4, %s885_s16  ;;  %p892_p10 = scmp.lt.u32.totalorder %s885_s16, %s1443_s4 }
  0x3a   : > { %p888_p1 = pnand %p886_p2, %p859_p13 }
  0x3c   : > { %p889_p6 = pneg %p888_p1 }
  0x3e   : > { %p894_p3 = pnand %p892_p10, %p889_p6 }
  0x40   : > { %897 = shalt.err (!%p894_p3)
}
  0x41   : > { %s898_s9 = scalar_lea.vmem %s1178_s12, 256  ;;  %p906_p12 = scmp.lt.s32.totalorder %s1178_s12, %s1178_s12 }
  0x42   : > { %p899_p5 = scmp.ne.s32.totalorder %s1178_s12, %s898_s9  ;;  %p907_p0 = scmp.lt.s32.totalorder %s898_s9, %s898_s9 }
  0x44   : > { %p901_p7 = pnand %p899_p5, %p859_p13  ;;  %p908_p2 = por %p907_p0, %p906_p12 }
  0x46   : > { %p902_p9 = pneg %p901_p7 }
  0x48   : > { %p909_p1 = pnand %p908_p2, %p902_p9 }
  0x4a   : > { %912 = shalt.err (!%p909_p1)
}
  0x4b   : > { %777 = dma.hbm_to_vmem [thread:$0]  (!%p1174_p11), %s1443_s4, 256, %s1178_s12, [#allocation9], %s1071_s28, %s1071_s28, %s1072_s8  }
  0x4c   : > { %s38_s14 = sadd.s32 1, %s1063_s25  ;;  %s45_s15 = sadd.s32 1, %s1055_s23 }
  0x4d   : > { %p40_p13 = scmp.ge.s32.totalorder %s38_s14, 2  ;;  %p52_p6 = scmp.ne.s32.totalorder %s1055_s23, %s1051_s22 }
  0x4e   : > { %p53_p10 = scmp.eq.s32.totalorder %s1067_s26, 0  ;;  %p791_p3 = scmp.lt.s32.totalorder %s1067_s26, 2 }
  0x4f   : > { %s1466_s14 = smov (%p40_p13, %s38_s14), 0  ;;  %p1445_p7 = scmp.eq.s32.totalorder %s1144_s27, 1 }
  0x50   : > { %1444 = sst [smem:[#allocation16_spill]] %s1466_s14  ;;  %p54_p5 = por %p53_p10, %p52_p6 }
  0x51   : > { %p1242_p9 = por %p1445_p7, %p52_p6  ;;  %s42_s16 = ssub.s32 %s1063_s25, %s1466_s14 }
  0x52   : > { %s1249_s17 = sand.u32 1, %s1055_s23   ;;  %p43_p11 = scmp.eq.s32.totalorder %s42_s16, 0 }
  0x53   : > { %s1446_s10 = scalar_select %p1242_p9, 1, 0 }
  0x54   : > { %s704_s12 = sshll.u32 %s1063_s25, 4  ;;  %s1447_s0 = sld [smem:[#allocation17_spill]] }
  0x55   : > { %s1253_s28 = scalar_select %p43_p11, %s1055_s23, %s45_s15  }
  0x56   : > { %s255_s20 = scalar_lea.vmem [#allocation2], %s1249_s17  ;;  %p1265_p12 = pnand %p791_p3, %p54_p5 }
  0x57   : > { %s262_s9 = sshll.u32 %s255_s20, 4  ;;  %s705_s15 = sshll.u32 %s1249_s17, 2  ;;  %s1261_s9 = int_to_ptr.vmem [resolvable:$true] %s262_s9 }
  0x58   : > { %s253_s16 = scalar_lea.sflag [#allocation3], %s1249_s17  ;;  %p915_p2 = pneg %p1265_p12 }
  0x5a   : > { %s1258_s19 = scalar_lea.hbm %s1447_s0, %s704_s12  ;;  %s918_s20 = scalar_lea.hbm %s1447_s0, 32 }
  0x5b   : > { %s913_s12 = scalar_lea.hbm %s1258_s19, 16  ;;  %p919_p6 = scmp.lt.u32.totalorder %s1258_s19, %s1447_s0 }
  0x5c   : > { %p914_p0 = scmp.ne.s32.totalorder %s1258_s19, %s913_s12  ;;  %p920_p10 = scmp.lt.u32.totalorder %s918_s20, %s913_s12 }
  0x5d   : > { %p922_p5 = scmp.lt.u32.totalorder %s913_s12, %s1258_s19 }
  0x5e   : > { %p916_p1 = pnand %p915_p2, %p914_p0  ;;  %p921_p3 = por %p920_p10, %p919_p6 }
  0x60   : > { %p917_p13 = pneg %p916_p1  ;;  %p923_p7 = por %p922_p5, %p921_p3 }
  0x62   : > { %p924_p11 = pnand %p923_p7, %p917_p13 }
  0x64   : > { %927 = shalt.err (!%p924_p11)
}
  0x65   : > { %s928_s13 = scalar_lea.vmem %s1261_s9, 16  ;;  %s1073_s8 = smov [#allocation2]  }
  0x66   : > { %p929_p0 = scmp.ne.s32.totalorder %s1261_s9, %s928_s13  ;;  %s933_s18 = sshll.u32 %s1073_s8, 4  ;;  %s934_s18 = int_to_ptr.vmem [resolvable:$false] %s933_s18 }
  0x67   : > { %s935_s2 = scalar_lea.vmem %s934_s18, 32  ;;  %p936_p4 = scmp.lt.s32.totalorder %s1261_s9, %s934_s18 }
  0x68   : > { %p931_p1 = pnand %p929_p0, %p915_p2  ;;  %p937_p6 = scmp.lt.s32.totalorder %s935_s2, %s928_s13 }
  0x6a   : > { %p932_p9 = pneg %p931_p1  ;;  %p938_p10 = por %p937_p6, %p936_p4 }
  0x6c   : > { %p939_p3 = pnand %p938_p10, %p932_p9 }
  0x6e   : > { %942 = shalt.err (!%p939_p3)
}
  0x6f   : > { %781 = dma.hbm_to_vmem [thread:$0]  (!%p1265_p12), %s1258_s19, 16, %s1261_s9, %s253_s16  }
  0x70   : > { %s706_s4 = sshll.u32 %s1063_s25, 6  ;;  %s273_s13 = scalar_lea.vmem [#allocation5], %s705_s15 }
  0x71   : > { %s1301_s8 = scalar_lea.hbm %s1424_s1, %s706_s4  ;;  %s280_s18 = sshll.u32 %s273_s13, 4  ;;  %s281_s18 = int_to_ptr.vmem [resolvable:$true] %s280_s18 }
  0x72   : > { %s1449_s2 = sand.u32 1, %s1067_s26   ;;  %s943_s14 = scalar_lea.hbm %s1301_s8, 64 }
  0x73   : > { %s270_s0 = scalar_lea.sflag [#allocation6], %s1449_s2  ;;  %p944_p4 = scmp.ne.s32.totalorder %s1301_s8, %s943_s14 }
  0x74   : > { %s948_s16 = scalar_lea.hbm %s1424_s1, 128  ;;  %p949_p5 = scmp.lt.u32.totalorder %s1301_s8, %s1424_s1 }
  0x75   : > { %p946_p9 = pnand %p944_p4, %p915_p2  ;;  %p950_p7 = scmp.lt.u32.totalorder %s948_s16, %s943_s14 }
  0x76   : > { %p952_p0 = scmp.lt.u32.totalorder %s943_s14, %s1301_s8 }
  0x77   : > { %p947_p13 = pneg %p946_p9  ;;  %p951_p11 = por %p950_p7, %p949_p5 }
  0x79   : > { %p953_p1 = por %p952_p0, %p951_p11 }
  0x7b   : > { %p954_p6 = pnand %p953_p1, %p947_p13 }
  0x7d   : > { %957 = shalt.err (!%p954_p6)
}
  0x7e   : > { %s958_s15 = scalar_lea.vmem %s281_s18, 64  ;;  %s1074_s12 = smov [#allocation5]  }
  0x7f   : > { %p959_p10 = scmp.ne.s32.totalorder %s281_s18, %s958_s15  ;;  %s963_s20 = sshll.u32 %s1074_s12, 4  ;;  %s964_s20 = int_to_ptr.vmem [resolvable:$false] %s963_s20 }
  0x80   : > { %s965_s13 = scalar_lea.vmem %s964_s20, 128  ;;  %p966_p9 = scmp.lt.s32.totalorder %s281_s18, %s964_s20 }
  0x81   : > { %p961_p3 = pnand %p959_p10, %p915_p2  ;;  %p967_p8 = scmp.lt.s32.totalorder %s965_s13, %s958_s15 }
  0x83   : > { %p962_p4 = pneg %p961_p3  ;;  %p968_p5 = por %p967_p8, %p966_p9 }
  0x85   : > { %p969_p7 = pnand %p968_p5, %p962_p4 }
  0x87   : > { %972 = shalt.err (!%p969_p7)
}
  0x88   : > { %784 = dma.hbm_to_vmem [thread:$0]  (!%p1265_p12), %s1301_s8, 64, %s281_s18, %s270_s0  }
  0x89   : > { %p1450_p13 = scmp.ne.s32.totalorder %s1440_s7, 0 }
  0x8a   : > { %s1329_s14 = sand.u32 (!%p1450_p13), 1, %s1051_s22   ;;  %p1451_p2 = scmp.ne.s32.totalorder (!%p1450_p13), %s1438_s29, 0 }
  0x8b   : > { %289 = sbr.rel (%p1450_p13) target bundleno = 935 (0x3a7), region = 44  ;;  %s292_s2 = scalar_lea.sflag (!%p1450_p13), [#allocation3], %s1329_s14 }
  0x8c   : > { %s294_s19 = scalar_lea.vmem (!%p1450_p13), [#allocation2], %s1329_s14 }
  0x92   : > { %1026 = dma.done.wait (%p1451_p2), %s292_s2, 16  }
  0x93   : > { %1028 = vsyncadd (%p1451_p2), %s292_s2, 4294967280  ;;  %s299_s0 = sand.u32 1, %s1144_s27   ;;  %s708_s11 = sshll.u32 %s1329_s14, 2 }
  0x94   : > { %s300_s7 = scalar_lea.sflag [#allocation6], %s299_s0  ;;  %s303_s8 = scalar_lea.vmem [#allocation5], %s708_s11 }
  0x95   : > { %1030 = dma.done.wait (%p1451_p2), %s300_s7, 64  }
  0x96   : > { %1032 = vsyncadd (%p1451_p2), %s300_s7, 4294967232  ;;  %p1452_p8 = scmp.eq.s32.totalorder %s1144_s27, 0 }
  0x98   : > { %1034 = dma.done.wait (%p1452_p8), [#allocation6], 256   ;;  %p1453_p12 = pmov %p1452_p8 }
  0x99   : > { %p1454_p11 = pmov %p1452_p8 }
  0x9a   : > { %1036 = vsyncadd (%p1453_p12), [#allocation6], 4294967040 }
  0x9b   : > { %1038 = dma.done.wait (%p1454_p11), [#allocation9], 256   ;;  %p1455_p0 = pmov %p1452_p8 }
  0x9c   : > { %v1075_v0 = vmov 0.0   ;;  %vm1076_vm0 = vmmov 0   ;;  %v849_v1 = vld [vmem:[#allocation8] sm:$0xff]   ;;  %v850_v2 = vld [vmem:[#allocation8 + $0x8] sm:$0xff]   ;;  %v851_v3 = vld [vmem:[#allocation7] sm:$0xff]   ;;  %vm369_vm1 = vcmask 261120   ;;  %v534_v22 = vlaneseq }
  0x9d   : > { %1040 = vsyncadd (%p1455_p0), [#allocation9], 4294967040  ;;  %735 = vmatprep.subr.bf16.mxu0 %v1075_v0  ;;  %743 = vmatprep.subr.bf16.mxu1 %v1075_v0  ;;  %v852_v4 = vld [vmem:[#allocation7 + $0x8] sm:$0xff]   ;;  %v345_v5 = vld [vmem:[%s303_s8] sm:$0xf]  ;;  %vm550_vm3 = vcmask 64512  }
  0x9e   : > { %739 = vmatprep.mubr.msk.bf16.mxu0 %vm1076_vm0, %v1075_v0  ;;  %747 = vmatprep.mubr.msk.bf16.mxu1 %vm1076_vm0, %v1075_v0  ;;  %v419_v6 = vld [vmem:[%s303_s8] sm:$0xf]  ;;  %v712_v7 = vld [vmem:[%s1428_s5] ss:$0 sm:$0xff]  ;;  %v535_v23 = vshrl.u32 %v534_v22, 7  ;;  %v539_v24 = vand.u32 127, %v534_v22 }
  0x9f   : > { %736 = vmatpush3.bf16.msra.mxu0 %v849_v1  ;;  %744 = vmatpush3.bf16.msra.mxu1 %v851_v3  ;;  %v716_v12 = vld [vmem:[%s1426_s3] ss:$0 sm:$0xff]  ;;  %s711_s16 = sshll.u32 %s1329_s14, 3  ;;  %s724_s17 = sshll.u32 %s1059_s24, 7 }
  0xa0   : > { %737 = vmatprep.subr.bf16.mxu0 %v1075_v0  ;;  %745 = vmatprep.subr.bf16.mxu1 %v1075_v0  ;;  %vm540_vm2 = vcmp.lt.s32.totalorder %v539_v24, %v535_v23  ;;  %v722_v28 = vld [vmem:[%s294_s19] ss:$0 sm:$0xff]  ;;  %s343_s4 = scalar_lea.vmem [#allocation10], %s711_s16  ;;  %s1373_s13 = scalar_lea.hbm %s1429_s6, %s724_s17 }
  0xa1   : > { %s578_s15 = sshll.u32 %s343_s4, 4  ;;  %s564_s2 = scalar_lea.sflag [#allocation4], %s1329_s14  ;;  %s1375_s15 = int_to_ptr.vmem [resolvable:$true] %s578_s15 }
  0xa2   : > { %s973_s19 = scalar_lea.vmem %s1375_s15, 128  ;;  %p1456_p6 = scmp.ne.s32.totalorder %s1446_s10, 0 }
  0xa3   : > { %738 = vmatpush3.bf16.msra.mxu0 %v850_v2  ;;  %746 = vmatpush3.bf16.msra.mxu1 %v852_v4  ;;  %p974_p1 = scmp.ne.s32.totalorder %s1375_s15, %s973_s19  ;;  %s1077_s24 = smov [#allocation10]  }
  0xa4   : > { %751 = vmatprep.subr.bf16.mxu0 %v1075_v0  ;;  %s977_s0 = sshll.u32 %s1077_s24, 4  ;;  %s978_s0 = int_to_ptr.vmem [resolvable:$false] %s977_s0 }
  0xa5   : > { %p975_p10 = pnand %p974_p1, %p1456_p6  ;;  %s979_s11 = scalar_lea.vmem %s978_s0, 256 }
  0xa6   : > { %740 = vmatmul.mubr.msk.bf16.vlgmr.msra.gmra.mrb[0].mxu0 %vm369_vm1, %v345_v5  ;;  %748 = vmatmul.mubr.msk.bf16.vlgmr.msra.gmra.mrb[0].mxu1 %vm369_vm1, %v419_v6  ;;  %p980_p4 = scmp.lt.s32.totalorder %s1375_s15, %s978_s0  ;;  %p981_p9 = scmp.lt.s32.totalorder %s979_s11, %s973_s19 }
  0xa7   : > { %753 = vmatprep.mubr.msk.bf16.mxu0 %vm1076_vm0, %v1075_v0  ;;  %p976_p3 = pneg %p975_p10 }
  0xa8   : > { %p982_p5 = por %p981_p9, %p980_p4 }
  0xaa   : > { %p983_p7 = pnand %p982_p5, %p976_p3 }
 0x179   : > { %v407_v8 = vpop.f32.mrb[0].mxu0  ;;  %v481_v13 = vpop.f32.mrb[0].mxu1 }
 0x17a   : > { %v408_v9 = vadd.f32 %v712_v7, %v407_v8  ;;  %v741_v10 = vpop.f32.mrb[1].mxu0  ;;  %v749_v16 = vpop.f32.mrb[1].mxu1  ;;  %v482_v19 = vadd.f32 %v716_v12, %v481_v13 }
 0x17b   : > { %v410_v11 = vpop.f32.mrb[2].mxu0  ;;  %v484_v17 = vpop.f32.mrb[2].mxu1 }
 0x17c   : > { %v413_v14 = vpack.c.bf16 %v408_v9, %v408_v9  ;;  %v742_v15 = vpop.f32.mrb[3].mxu0  ;;  %v750_v20 = vpop.f32.mrb[3].mxu1  ;;  %v487_v21 = vpack.c.bf16 %v482_v19, %v482_v19 }
 0x17e   : > { %v492_v18 = vsel %vm369_vm1, %v413_v14, 0 }
 0x17f   : > { %752 = vmatpush3.bf16.xpose.msra.mxu0 %v492_v18 }
 0x186   : > { %754 = vmatmul.mubr.msk.bf16.vlgmr.msra.gmra.mrb[4].mxu0 %vm369_vm1, %v487_v21 }
 0x259   : > { %v528_v25 = vpop.f32.mrb[4].mxu0 }
 0x25a   : > { %v721_v26 = vadd.f32 -1000.0, %v528_v25  ;;  %v755_v27 = vpop.f32.mrb[5].mxu0 }
 0x25b   : > { %v531_v29 = vpop.f32.mrb[6].mxu0 }
 0x25c   : > { %v542_v30 = vsel %vm540_vm2, %v721_v26, %v528_v25  ;;  %v756_v31 = vpop.f32.mrb[7].mxu0 }
 0x25d   : > { %v549_v32 = vadd.f32 %v722_v28, %v542_v30 }
 0x25f   : > { %v551_v33 = vsel %vm550_vm3, %v549_v32, -inf }
 0x260   : > { %552 = vmax.xlane.f32.xlu0 %v551_v33 }
 0x2ed   : > { %v553_v34 = vpop.xlane.xlu0 %552 }
 0x2ee   : > { %v554_v35 = vsub.f32 %v549_v32, %v553_v34 }
 0x2f0   : > { %v555_v36 = vmul.f32 1.442695, %v554_v35 }
 0x2f2   : > { %853 = vpow2.f32 %v555_v36 }
 0x2fc   : > { %v854_v37 = vpop.eup %853 }
 0x2fd   : > { %v557_v38 = vsel %vm550_vm3, %v854_v37, 0.0 }
 0x2fe   : > { %558 = vadd.xlane.f32.xlu0 %v557_v38 }
 0x38b   : > { %v559_v39 = vpop.xlane.xlu0 %558 }
 0x38c   : > { %855 = vrcp.f32 %v559_v39 }
 0x396   : > { %v856_v40 = vpop.eup %855 }
 0x397   : > { %v561_v41 = vmul.f32 %v856_v40, %v854_v37 }
 0x399   : > { %562 = vst.msk [vmem:[%s343_s4] sm:$0xff] %vm550_vm3, %v561_v41 }
 0x39a   : > { %986 = shalt.err (!%p983_p7)
}
 0x39b   : > { %s987_s14 = scalar_lea.hbm %s1373_s13, 128  ;;  %s991_s27 = scalar_lea.hbm %s1429_s6, 256 }
 0x39c   : > { %p988_p13 = scmp.ne.s32.totalorder %s1373_s13, %s987_s14  ;;  %p992_p12 = scmp.lt.u32.totalorder %s1373_s13, %s1429_s6 }
 0x39d   : > { %p993_p11 = scmp.lt.u32.totalorder %s991_s27, %s987_s14  ;;  %p995_p1 = scmp.lt.u32.totalorder %s987_s14, %s1373_s13 }
 0x39e   : > { %p989_p2 = pnand %p988_p13, %p1456_p6 }
 0x39f   : > { %p994_p0 = por %p993_p11, %p992_p12 }
 0x3a0   : > { %p990_p8 = pneg %p989_p2 }
 0x3a1   : > { %p996_p10 = por %p995_p1, %p994_p0 }
 0x3a3   : > { %p997_p3 = pnand %p996_p10, %p990_p8 }
 0x3a5   : > { %1000 = shalt.err (!%p997_p3)
}
 0x3a6   : > { %769 = dma.vmem_to_hbm [thread:$0]  (%p1456_p6), %s1375_s15, 128, %s1373_s13, %s564_s2  }
 0x3a7 PF: > { %s590_s9 = sand.u32 1, %s1047_s21   ;;  %p1457_p4 = scmp.ne.s32.totalorder %s1439_s30, 0 }
 0x3a8   : > { %p1458_p9 = scmp.ge.s32.totalorder %s1067_s26, 2  ;;  %s591_s16 = scalar_lea.sflag [#allocation4], %s590_s9 }
 0x3aa   : > { %p786_p5 = pnand %p1458_p9, %p1457_p4 }
 0x3ac   : > { %1042 = dma.done.wait (!%p786_p5), %s591_s16, 128  }
 0x3ad   : > { %1044 = vsyncadd (!%p786_p5), %s591_s16, 4294967168  ;;  %s26_s26 = sadd.s32 1, %s1067_s26   ;;  %s1459_s10 = sld [smem:[#allocation16_spill]] }
 0x3ae   : > { %p23_p7 = scmp.ge.s32.totalorder %s26_s26, 4   ;;  %s1460_s21 = smov %s1051_s22 }
 0x3af   : > { %s1461_s22 = smov %s1055_s23  ;;  %s1462_s23 = smov %s1253_s28 }
 0x3b0   : > { %s1463_s24 = smov %s1063_s25  ;;  %25 = sbr.rel (!%p23_p7) target bundleno = 13 (0xd), region = 111 }
 0x3b3   : > { %s1464_s25 = smov %s1459_s10 }
 0x3b7   :  { %596 = vsyncpa [#allocation3], 1 }
 0x3b8   :  { %598 = vsyncpa [#allocation3 + $0x1], 1 }
 0x3b9   :  { %599 = vsyncpa [#allocation6], 1 }
 0x3ba   :  { %601 = vsyncpa [#allocation6 + $0x1], 1 }
 0x3bb   :  { %602 = vsyncpa [#allocation9], 1 }
 0x3bc   :  { %603 = vsyncpa [#allocation4], 1 }
 0x3bd   :  { %605 = vsyncpa [#allocation4 + $0x1], 1 }

</bundles_post_ra>
